<compile_context>
chip_gen: v6e
topology: v6e:2x2x1
jax: 0.10.0
libtpu: 0.0.40
codegen_flags: <defaults>
</compile_context>

<pallas_src>
import math

import jax
import jax.numpy as jnp
from jax.experimental import pallas as pl
from jax.experimental.pallas import tpu as pltpu

_LANE = 128


def _modulation_kernel(cond_ref, w1_ref, b1_ref, w2s_ref, b2s1_ref,
                       w2t_ref, b2t_ref, x_ref, out_ref):
    """One (1, tile_m, W) tile of  out = x * (1 + scale) + shift.

    The per-batch MLP producing scale/shift is recomputed here (tiny; hidden
    under the x/out DMA).  b2s1 already contains the folded "+1".
    """
    cond = cond_ref[0].astype(jnp.float32)                               # [1, C]
    h = jnp.dot(cond, w1_ref[...], preferred_element_type=jnp.float32) + b1_ref[...]
    h = h * jax.nn.sigmoid(h)                                            # SiLU
    s1 = jnp.dot(h, w2s_ref[...], preferred_element_type=jnp.float32) + b2s1_ref[...]
    sh = jnp.dot(h, w2t_ref[...], preferred_element_type=jnp.float32) + b2t_ref[...]
    cdt = x_ref.dtype
    s1 = s1.reshape(1, 1, -1).astype(cdt)                                # [1, 1, W]
    sh = sh.reshape(1, 1, -1).astype(cdt)
    out_ref[...] = x_ref[...] * s1 + sh                                  # pure FMA


def modulation_forward(x, condition, w1, b1, w2, b2, *,
                       single_layer=False, max_tile_rows=None, donate_x=False):
    """x: [B, S, E], condition: [B, C], w1: [C, C], b1: [C], w2: [C, 2E], b2: [2E].

    single_layer=True reproduces nn.Identity for linear1 (w1/b1 ignored).
    donate_x=True aliases x's HBM buffer for the output (only if x is dead after).
    """
    B, S, E = x.shape
    C = condition.shape[-1]
    f32 = jnp.float32

    if single_layer:
        w1 = jnp.eye(C, dtype=f32)
        b1 = jnp.zeros((C,), dtype=f32)
    else:
        assert w1.shape == (C, C) and b1.shape == (C,)
        w1, b1 = w1.astype(f32), b1.astype(f32)
    assert w2.shape == (C, 2 * E) and b2.shape == (2 * E,)
    w2, b2 = w2.astype(f32), b2.astype(f32)

    # Split linear2 into scale/shift halves (no non-aligned lane slicing inside
    # the kernel) and fold the "+1" into the scale bias.
    w2s, w2t = w2[:, :E], w2[:, E:]
    b2s, b2t = b2[:E] + 1.0, b2[E:]

    # ---- Lane packing: W = lcm(E, 128) (smallest lane-dense width holding a
    #      whole number of embedding vectors) whenever it divides S*E. ----
    Wd = E * _LANE // math.gcd(E, _LANE)
    if (S * E) % Wd == 0:
        pack = Wd // E
    else:
        Wd, pack = E, 1                      # fallback: lane-sparse but legal
    M = (S * E) // Wd                        # packed rows per batch
    x_p = x.reshape(B, M, Wd)                # contiguous reshape
    if pack > 1:                             # tile producers across packed lanes
        w2s = jnp.tile(w2s, (1, pack))
        w2t = jnp.tile(w2t, (1, pack))
        b2s = jnp.tile(b2s, (pack,))
        b2t = jnp.tile(b2t, (pack,))
    cond3 = condition.astype(f32).reshape(B, 1, C)
    b1r = b1.reshape(1, C)
    b2sr = b2s.reshape(1, Wd)
    b2tr = b2t.reshape(1, Wd)

    # ---- Row-tile sizing: ~2 MiB x-tiles (4 double-buffered tiles stay well
    #      inside v5e's 16 MiB default scoped VMEM), dtype-aware sublane pad. ----
    itemsize = jnp.dtype(x.dtype).itemsize
    sub = max(8, 32 // itemsize)                      # 8 f32 / 16 bf16 / 32 int8
    target_bytes = 2 << 20
    tile_m = max(sub, (target_bytes // (Wd * itemsize)) // sub * sub)
    if max_tile_rows is not None:
        tile_m = max(sub, min(tile_m, (max_tile_rows // sub) * sub))
    if B == 1 and M > sub:
        # Guarantee >= 2 row tiles so both v7x TensorCores get work (both grid
        # axes are "parallel"); no effect on single-TC v5e/v6e.
        half = ((M + 1) // 2 + sub - 1) // sub * sub
        if half < M:
            tile_m = min(tile_m, half)
    if tile_m >= M:
        tile_m = M                                    # full extent: always legal
    grid = (B, pl.cdiv(M, tile_m))

    # ---- VMEM / cost bookkeeping. ----
    weight_bytes = 4 * (C * C + 3 * C + 2 * (C * Wd + Wd))
    tile_bytes = tile_m * Wd * itemsize
    vmem_need = 4 * tile_bytes + 2 * weight_bytes + (1 << 20)
    cp_kwargs = dict(dimension_semantics=("parallel", "parallel"))
    if vmem_need > (12 << 20):                        # only raise when required
        cp_kwargs["vmem_limit_bytes"] = int(min(vmem_need + (4 << 20), 56 << 20))
    n_tiles = B * grid[1]
    cost = pl.CostEstimate(
        flops=int(n_tiles * (2 * C * C + 4 * C * Wd) + 2 * B * M * Wd),
        transcendentals=int(n_tiles * C),
        bytes_accessed=int(2 * B * M * Wd * itemsize + weight_bytes),
    )

    call_kwargs = {}
    if donate_x:
        # Reuse x's HBM buffer for the output (only valid if x is dead after).
        call_kwargs["input_output_aliases"] = {7: 0}
    # TODO(synk): callers should pass donate_x=True whenever x is not used after
    # this op so XLA can drop the extra output allocation.

    resident = lambda b, m: (0, 0)                    # weights stay in VMEM
    out_p = pl.pallas_call(
        _modulation_kernel,
        out_shape=jax.ShapeDtypeStruct((B, M, Wd), x.dtype),
        grid=grid,
        in_specs=[
            pl.BlockSpec((1, 1, C), lambda b, m: (b, 0, 0)),        # condition row
            pl.BlockSpec((C, C), resident),                         # w1
            pl.BlockSpec((1, C), resident),                         # b1
            pl.BlockSpec((C, Wd), resident),                        # w2 scale half (lane-tiled)
            pl.BlockSpec((1, Wd), resident),                        # 1 + b2 scale half
            pl.BlockSpec((C, Wd), resident),                        # w2 shift half
            pl.BlockSpec((1, Wd), resident),                        # b2 shift half
            pl.BlockSpec((1, tile_m, Wd), lambda b, m: (b, m, 0)),  # x tile
        ],
        out_specs=pl.BlockSpec((1, tile_m, Wd), lambda b, m: (b, m, 0)),
        compiler_params=pltpu.CompilerParams(**cp_kwargs),
        cost_estimate=cost,
        **call_kwargs,
    )(cond3, w1, b1r, w2s, b2sr, w2t, b2tr, x_p)

    return out_p.reshape(B, S, E)


def modulation_reference(x, condition, w1, b1, w2, b2):
    h = condition @ w1 + b1
    h = h * jax.nn.sigmoid(h)
    emb = h @ w2 + b2
    e = x.shape[-1]
    scale, shift = emb[:, :e], emb[:, e:]
    return x * (1.0 + scale[:, None, :]) + shift[:, None, :]


def _make_inputs(key, B, S, E, C, x_dtype=jnp.float32):
    k = jax.random.split(key, 6)
    x = jax.random.normal(k[0], (B, S, E), dtype=jnp.float32).astype(x_dtype)
    cond = jax.random.normal(k[1], (B, C), dtype=jnp.float32)
    w1 = jax.random.normal(k[2], (C, C), dtype=jnp.float32) * 0.05
    b1 = jax.random.normal(k[3], (C,), dtype=jnp.float32) * 0.05
    w2 = jax.random.normal(k[4], (C, 2 * E), dtype=jnp.float32) * 0.05
    b2 = jax.random.normal(k[5], (2 * E,), dtype=jnp.float32) * 0.05
    return x, cond, w1, b1, w2, b2


if __name__ == "__main__":
    # 1) Small shapes consistent with the module: batch=2, seq=8, embedding=32, cond=32.
    x, cond, w1, b1, w2, b2 = _make_inputs(jax.random.PRNGKey(0), 2, 8, 32, 32)
    out = jax.block_until_ready(modulation_forward(x, cond, w1, b1, w2, b2))
    ref = modulation_reference(x, cond, w1, b1, w2, b2)
    assert out.shape == (2, 8, 32)
    assert jnp.allclose(out, ref, atol=1e-5, rtol=1e-5), "mismatch (small shape)"

    # 2) Lane-packed (pack=2), multi-tile pipelined path with a ragged last tile.
    x, cond, w1, b1, w2, b2 = _make_inputs(jax.random.PRNGKey(1), 2, 256, 64, 48)
    out = jax.block_until_ready(
        modulation_forward(x, cond, w1, b1, w2, b2, max_tile_rows=48))
    ref = modulation_reference(x, cond, w1, b1, w2, b2)
    assert jnp.allclose(out, ref, atol=1e-4, rtol=1e-4), "mismatch (ragged tiled)"

    # 3) Lane-sparse fallback (W=E=48 not a multiple of 128) + B==1 row-tile split.
    x, cond, w1, b1, w2, b2 = _make_inputs(jax.random.PRNGKey(2), 1, 10, 48, 32)
    out = jax.block_until_ready(modulation_forward(x, cond, w1, b1, w2, b2))
    ref = modulation_reference(x, cond, w1, b1, w2, b2)
    assert jnp.allclose(out, ref, atol=1e-5, rtol=1e-5), "mismatch (fallback W=E)"

    # 4) bf16 x (bf16 FMA path), pack=4 via lcm(96,128)=384, donated x buffer.
    x, cond, w1, b1, w2, b2 = _make_inputs(
        jax.random.PRNGKey(3), 2, 64, 96, 64, x_dtype=jnp.bfloat16)
    ref = modulation_reference(x.astype(jnp.float32), cond, w1, b1, w2, b2)
    out = jax.block_until_ready(
        modulation_forward(x, cond, w1, b1, w2, b2, donate_x=True))
    del x  # donated: not used after the call
    assert jnp.allclose(out.astype(jnp.float32), ref, atol=0.08, rtol=0.05), \
        "mismatch (bf16 / donated)"

    print("KERNEL_OK")
</pallas_src>

<mosaic_0001>
module attributes {stable_mosaic.version = 11 : i64} {
  func.func @_modulation_kernel(%arg0: i32, %arg1: i32, %arg2: memref<1x1x32xf32, #tpu.memory_space<vmem>>, %arg3: memref<32x32xf32, #tpu.memory_space<vmem>>, %arg4: memref<1x32xf32, #tpu.memory_space<vmem>>, %arg5: memref<32x128xf32, #tpu.memory_space<vmem>>, %arg6: memref<1x128xf32, #tpu.memory_space<vmem>>, %arg7: memref<32x128xf32, #tpu.memory_space<vmem>>, %arg8: memref<1x128xf32, #tpu.memory_space<vmem>>, %arg9: memref<1x2x128xf32, #tpu.memory_space<vmem>>, %arg10: memref<1x2x128xf32, #tpu.memory_space<vmem>>) attributes {dimension_semantics = [#tpu.dimension_semantics<parallel>, #tpu.dimension_semantics<parallel>], iteration_bounds = array<i64: 2, 1>, scalar_prefetch = 0 : i64, scratch_operands = 0 : i64, tpu.core_type = #tpu.core_type<tc>, window_params = [{transform_indices = @transform_0, window_bounds = array<i64: 1, 1, 32>}, {pipeline_mode = #tpu.pipeline_mode<synchronous>, transform_indices = @transform_1, window_bounds = array<i64: 32, 32>}, {pipeline_mode = #tpu.pipeline_mode<synchronous>, transform_indices = @transform_2, window_bounds = array<i64: 1, 32>}, {pipeline_mode = #tpu.pipeline_mode<synchronous>, transform_indices = @transform_3, window_bounds = array<i64: 32, 128>}, {pipeline_mode = #tpu.pipeline_mode<synchronous>, transform_indices = @transform_4, window_bounds = array<i64: 1, 128>}, {pipeline_mode = #tpu.pipeline_mode<synchronous>, transform_indices = @transform_5, window_bounds = array<i64: 32, 128>}, {pipeline_mode = #tpu.pipeline_mode<synchronous>, transform_indices = @transform_6, window_bounds = array<i64: 1, 128>}, {transform_indices = @transform_7, window_bounds = array<i64: 1, 2, 128>}, {transform_indices = @transform_8, window_bounds = array<i64: 1, 2, 128>}]} {
    %c0 = arith.constant 0 : index
    %c0_0 = arith.constant 0 : index
    %c0_1 = arith.constant 0 : index
    %0 = vector.load %arg2[%c0, %c0_0, %c0_1] : memref<1x1x32xf32, #tpu.memory_space<vmem>>, vector<1x1x32xf32>
    %1 = vector.shape_cast %0 : vector<1x1x32xf32> to vector<1x32xf32>
    %c0_2 = arith.constant 0 : index
    %c0_3 = arith.constant 0 : index
    %2 = vector.load %arg3[%c0_2, %c0_3] : memref<32x32xf32, #tpu.memory_space<vmem>>, vector<32x32xf32>
    %cst = arith.constant dense<0.000000e+00> : vector<1x32xf32>
    %3 = tpu.matmul %1, %2, %cst {dimension_numbers = #tpu.dot_dimension_numbers<[1], [0], [0], [1], [0, 0, 1, 1], [], []>} : vector<1x32xf32>, vector<32x32xf32>, vector<1x32xf32> -> vector<1x32xf32>
    %c0_4 = arith.constant 0 : index
    %c0_5 = arith.constant 0 : index
    %4 = vector.load %arg4[%c0_4, %c0_5] : memref<1x32xf32, #tpu.memory_space<vmem>>, vector<1x32xf32>
    %5 = arith.addf %3, %4 : vector<1x32xf32>
    %6 = arith.negf %5 : vector<1x32xf32>
    %7 = math.exp %6 : vector<1x32xf32>
    %cst_6 = arith.constant 1.000000e+00 : f32
    %8 = vector.broadcast %cst_6 : f32 to vector<1x32xf32>
    %9 = arith.addf %8, %7 : vector<1x32xf32>
    %10 = arith.divf %8, %9 : vector<1x32xf32>
    %11 = arith.mulf %5, %10 : vector<1x32xf32>
    %c0_7 = arith.constant 0 : index
    %c0_8 = arith.constant 0 : index
    %12 = vector.load %arg5[%c0_7, %c0_8] : memref<32x128xf32, #tpu.memory_space<vmem>>, vector<32x128xf32>
    %cst_9 = arith.constant dense<0.000000e+00> : vector<1x128xf32>
    %13 = tpu.matmul %11, %12, %cst_9 {dimension_numbers = #tpu.dot_dimension_numbers<[1], [0], [0], [1], [0, 0, 1, 1], [], []>} : vector<1x32xf32>, vector<32x128xf32>, vector<1x128xf32> -> vector<1x128xf32>
    %c0_10 = arith.constant 0 : index
    %c0_11 = arith.constant 0 : index
    %14 = vector.load %arg6[%c0_10, %c0_11] : memref<1x128xf32, #tpu.memory_space<vmem>>, vector<1x128xf32>
    %15 = arith.addf %13, %14 : vector<1x128xf32>
    %c0_12 = arith.constant 0 : index
    %c0_13 = arith.constant 0 : index
    %16 = vector.load %arg7[%c0_12, %c0_13] : memref<32x128xf32, #tpu.memory_space<vmem>>, vector<32x128xf32>
    %cst_14 = arith.constant dense<0.000000e+00> : vector<1x128xf32>
    %17 = tpu.matmul %11, %16, %cst_14 {dimension_numbers = #tpu.dot_dimension_numbers<[1], [0], [0], [1], [0, 0, 1, 1], [], []>} : vector<1x32xf32>, vector<32x128xf32>, vector<1x128xf32> -> vector<1x128xf32>
    %c0_15 = arith.constant 0 : index
    %c0_16 = arith.constant 0 : index
    %18 = vector.load %arg8[%c0_15, %c0_16] : memref<1x128xf32, #tpu.memory_space<vmem>>, vector<1x128xf32>
    %19 = arith.addf %17, %18 : vector<1x128xf32>
    %20 = vector.shape_cast %15 : vector<1x128xf32> to vector<1x1x128xf32>
    %21 = vector.shape_cast %19 : vector<1x128xf32> to vector<1x1x128xf32>
    %c0_17 = arith.constant 0 : index
    %c0_18 = arith.constant 0 : index
    %c0_19 = arith.constant 0 : index
    %22 = vector.load %arg9[%c0_17, %c0_18, %c0_19] : memref<1x2x128xf32, #tpu.memory_space<vmem>>, vector<1x2x128xf32>
    %23 = vector.broadcast %20 : vector<1x1x128xf32> to vector<1x2x128xf32>
    %24 = arith.mulf %22, %23 : vector<1x2x128xf32>
    %25 = vector.broadcast %21 : vector<1x1x128xf32> to vector<1x2x128xf32>
    %26 = arith.addf %24, %25 : vector<1x2x128xf32>
    %c0_20 = arith.constant 0 : index
    %c0_21 = arith.constant 0 : index
    %c0_22 = arith.constant 0 : index
    %27 = vector.load %arg10[%c0_20, %c0_21, %c0_22] : memref<1x2x128xf32, #tpu.memory_space<vmem>>, vector<1x2x128xf32>
    tpu.vector_store %arg10[%c0_20, %c0_21, %c0_22], %26 {strides = array<i32>} : memref<1x2x128xf32, #tpu.memory_space<vmem>>, vector<1x2x128xf32>,
    return
  }
  func.func @transform_0(%arg0: i32, %arg1: i32) -> (i32, i32, i32) {
    %c0_i32 = arith.constant 0 : i32
    %c0_i32_0 = arith.constant 0 : i32
    %c0_i32_1 = arith.constant 0 : i32
    return %arg0, %c0_i32, %c0_i32_0 : i32, i32, i32
  }
  func.func @transform_1(%arg0: i32, %arg1: i32) -> (i32, i32) {
    %c0_i32 = arith.constant 0 : i32
    %c0_i32_0 = arith.constant 0 : i32
    %c0_i32_1 = arith.constant 0 : i32
    return %c0_i32, %c0_i32_0 : i32, i32
  }
  func.func @transform_2(%arg0: i32, %arg1: i32) -> (i32, i32) {
    %c0_i32 = arith.constant 0 : i32
    %c0_i32_0 = arith.constant 0 : i32
    %c0_i32_1 = arith.constant 0 : i32
    return %c0_i32, %c0_i32_0 : i32, i32
  }
  func.func @transform_3(%arg0: i32, %arg1: i32) -> (i32, i32) {
    %c0_i32 = arith.constant 0 : i32
    %c0_i32_0 = arith.constant 0 : i32
    %c0_i32_1 = arith.constant 0 : i32
    return %c0_i32, %c0_i32_0 : i32, i32
  }
  func.func @transform_4(%arg0: i32, %arg1: i32) -> (i32, i32) {
    %c0_i32 = arith.constant 0 : i32
    %c0_i32_0 = arith.constant 0 : i32
    %c0_i32_1 = arith.constant 0 : i32
    return %c0_i32, %c0_i32_0 : i32, i32
  }
  func.func @transform_5(%arg0: i32, %arg1: i32) -> (i32, i32) {
    %c0_i32 = arith.constant 0 : i32
    %c0_i32_0 = arith.constant 0 : i32
    %c0_i32_1 = arith.constant 0 : i32
    return %c0_i32, %c0_i32_0 : i32, i32
  }
  func.func @transform_6(%arg0: i32, %arg1: i32) -> (i32, i32) {
    %c0_i32 = arith.constant 0 : i32
    %c0_i32_0 = arith.constant 0 : i32
    %c0_i32_1 = arith.constant 0 : i32
    return %c0_i32, %c0_i32_0 : i32, i32
  }
  func.func @transform_7(%arg0: i32, %arg1: i32) -> (i32, i32, i32) {
    %c0_i32 = arith.constant 0 : i32
    %c0_i32_0 = arith.constant 0 : i32
    return %arg0, %arg1, %c0_i32 : i32, i32, i32
  }
  func.func @transform_8(%arg0: i32, %arg1: i32) -> (i32, i32, i32) {
    %c0_i32 = arith.constant 0 : i32
    %c0_i32_0 = arith.constant 0 : i32
    return %arg0, %arg1, %c0_i32 : i32, i32, i32
  }
}

</mosaic_0001>

<bundles_post_ra>
// kernel: tpu_custom_call.1
= control target key start
LH: loop header
LB: loop body
LE: loop exit
PB: predicated region body
PF: predicated region fallthrough
CT: control target
= control target key end

     0   :  { %s1417_s0 = inlined_call_operand.hbm [shape: f32[2,1,32], index: 0, kind: input, shape index: {}]   ;;  %s1418_s1 = inlined_call_operand.hbm [shape: f32[32,32], index: 1, kind: input, shape index: {}]   ;;  %s1419_s2 = inlined_call_operand.vmem [shape: f32[1,32], index: 2, kind: input, shape index: {}]   ;;  %s1420_s3 = inlined_call_operand.hbm [shape: f32[32,128], index: 3, kind: input, shape index: {}]   ;;  %s1421_s4 = inlined_call_operand.vmem [shape: f32[1,128], index: 4, kind: input, shape index: {}]   ;;  %s1422_s5 = inlined_call_operand.hbm [shape: f32[32,128], index: 5, kind: input, shape index: {}]   ;;  %s1423_s6 = inlined_call_operand.vmem [shape: f32[1,128], index: 6, kind: input, shape index: {}]   ;;  %s1424_s7 = inlined_call_operand.vmem [shape: f32[2,2,128], index: 7, kind: input, shape index: {}]   ;;  %s1425_s8 = inlined_call_operand.hbm [shape: f32[2,2,128], index: 8, kind: output, shape index: {}]  }
   0x1   :  { %1430 = sst [smem:[#allocation15_spill]] %s1418_s1 }
   0x2   :  { %1431 = sst [smem:[#allocation16_spill]] %s1420_s3 }
   0x3   :  { %1432 = sst [smem:[#allocation17_spill]] %s1422_s5 }
   0x4   :  { %13 = vsyncpa [#allocation3], 0 }
   0x5   :  { %15 = vsyncpa [#allocation3 + $0x1], 0 }
   0x6   :  { %16 = vsyncpa [#allocation6], 0 }
   0x7   :  { %17 = vsyncpa [#allocation9], 0 }
   0x8   :  { %18 = vsyncpa [#allocation4], 0 }
   0x9   :  { %20 = vsyncpa [#allocation4 + $0x1], 0  ;;  %s1212_s27 = smov 0   ;;  %s1214_s28 = smov 0  }
   0xa   :  { %s1216_s29 = smov 0   ;;  %s1218_s30 = smov 0  }
   0xb   :  { %s1220_s9 = smov 0   ;;  %s1222_s10 = smov 0  }
   0xc LB: > { %s791_s11 = sadd.s32 4294967295, %s1156_s10   ;;  %s792_s12 = sadd.s32 4294967294, %s1156_s10   ;;  %s1156_s10 = sphi %s1222_s10, %s26_s10   ;;  %s1152_s9 = sphi %s1220_s9, %s1453_s9   ;;  %s1148_s30 = sphi %s1218_s30, %s1452_s30   ;;  %s1144_s29 = sphi %s1216_s29, %s1451_s29   ;;  %s1140_s28 = sphi %s1214_s28, %s1450_s28   ;;  %s1136_s27 = sphi %s1212_s27, %s1449_s27  }
   0xd   : > { %p58_p0 = scmp.ne.s32.totalorder %s1140_s28, %s1136_s27  ;;  %p1246_p1 = scmp.eq.s32.totalorder %s791_s11, 0 }
   0xe   : > { %p1250_p2 = scmp.eq.s32.totalorder %s791_s11, 1  ;;  %p244_p3 = scmp.eq.s32.totalorder %s792_s12, 1 }
   0xf   : > { %s1433_s13 = scalar_select %p1246_p1, 1, 0 }
  0x10   : > { %p1256_p4 = por %p1246_p1, %p58_p0  ;;  %p793_p5 = scmp.ge.s32.totalorder %s1156_s10, 1 }
  0x11   : > { %p1261_p6 = por %p244_p3, %p58_p0  ;;  %p251_p7 = scmp.lt.s32.totalorder %s1156_s10, 3 }
  0x12   : > { %s1435_s15 = scalar_select %p1256_p4, 1, 0 }
  0x13   : > { %s1436_s16 = scalar_select %p1261_p6, 1, 0 }
  0x14   : > { %p1266_p8 = pnand %p793_p5, %p251_p7  ;;  %s1158_s18 = smov [#allocation5]  }
  0x15   : > { %s263_s19 = sshll.u32 %s1158_s18, 4  ;;  %s1159_s21 = smov [#allocation7]   ;;  %s264_s19 = int_to_ptr.vmem [resolvable:$true] %s263_s19 }
  0x16   : > { %s1437_s17 = scalar_select %p1266_p8, 1, 0 }
  0x17   : > { %p877_p9 = pneg %p1266_p8  ;;  %s279_s22 = sshll.u32 %s1159_s21, 4  ;;  %s280_s22 = int_to_ptr.vmem [resolvable:$true] %s279_s22 }
  0x18   : > { %s1160_s23 = smov [#allocation8]   ;;  %s973_s25 = scalar_lea.vmem %s264_s19, 512 }
  0x19   : > { %p1275_p11 = pnand %p877_p9, %p1246_p1  ;;  %s295_s24 = sshll.u32 %s1160_s23, 4  ;;  %s296_s24 = int_to_ptr.vmem [resolvable:$true] %s295_s24 }
  0x1a   : > { %p974_p13 = scmp.ne.s32.totalorder %s264_s19, %s973_s25  ;;  %p981_p5 = scmp.lt.s32.totalorder %s264_s19, %s264_s19 }
  0x1b   : > { %p964_p12 = pneg %p1275_p11  ;;  %p982_p7 = scmp.lt.s32.totalorder %s973_s25, %s973_s25 }
  0x1d   : > { %p976_p0 = pnand %p974_p13, %p964_p12  ;;  %p983_p9 = por %p982_p7, %p981_p5 }
  0x1f   : > { %p977_p3 = pneg %p976_p0 }
  0x21   : > { %p984_p10 = pnand %p983_p9, %p977_p3 }
  0x23   : > { %987 = shalt.err (!%p984_p10)
}
  0x24   : > { %s1161_s26 = smov 128   ;;  %s1162_s11 = smov 8  }
  0x25   : > { %s1439_s1 = sld [smem:[#allocation15_spill]]  ;;  %s999_s21 = scalar_lea.vmem %s280_s22, 512 }
  0x26   : > { %p1000_p6 = scmp.ne.s32.totalorder %s280_s22, %s999_s21  ;;  %p1007_p1 = scmp.lt.s32.totalorder %s280_s22, %s280_s22 }
  0x27   : > { %p1008_p4 = scmp.lt.s32.totalorder %s999_s21, %s999_s21 }
  0x28   : > { %p1002_p13 = pnand %p1000_p6, %p964_p12 }
  0x29   : > { %p1009_p5 = por %p1008_p4, %p1007_p1 }
  0x2a   : > { %p1003_p0 = pneg %p1002_p13 }
  0x2b   : > { %880 = dma.hbm_to_vmem [thread:$0]  (!%p1275_p11), %s1439_s1, 512, %s264_s19, [#allocation6], %s1161_s26, %s1161_s26, %s1162_s11  }
  0x2c   : > { %p1010_p3 = pnand %p1009_p5, %p1003_p0 }
  0x2e   : > { %1013 = shalt.err (!%p1010_p3)
}
  0x2f   : > { %s1440_s3 = sld [smem:[#allocation16_spill]]  ;;  %s1025_s19 = scalar_lea.vmem %s296_s24, 512 }
  0x30   : > { %p1026_p10 = scmp.ne.s32.totalorder %s296_s24, %s1025_s19  ;;  %p1033_p9 = scmp.lt.s32.totalorder %s296_s24, %s296_s24 }
  0x31   : > { %p1034_p13 = scmp.lt.s32.totalorder %s1025_s19, %s1025_s19 }
  0x32   : > { %p1028_p7 = pnand %p1026_p10, %p964_p12 }
  0x33   : > { %p1035_p8 = por %p1034_p13, %p1033_p9 }
  0x34   : > { %p1029_p6 = pneg %p1028_p7 }
  0x35   : > { %883 = dma.hbm_to_vmem [thread:$0]  (!%p1275_p11), %s1440_s3, 512, %s280_s22, [#allocation6], %s1161_s26, %s1161_s26, %s1162_s11  }
  0x36   : > { %p1036_p1 = pnand %p1035_p8, %p1029_p6 }
  0x38   : > { %1039 = shalt.err (!%p1036_p1)
}
  0x39   : > { %s1441_s5 = sld [smem:[#allocation17_spill]]  ;;  %s38_s22 = sadd.s32 1, %s1152_s9 }
  0x3a   : > { %p52_p4 = scmp.ne.s32.totalorder %s1144_s29, %s1140_s28  ;;  %p40_p8 = scmp.ge.s32.totalorder %s38_s22, 2 }
  0x3b   : > { %p53_p12 = scmp.eq.s32.totalorder %s1156_s10, 0  ;;  %s45_s20 = sadd.s32 1, %s1144_s29 }
  0x3c   : > { %p1312_p0 = por %p1250_p2, %p52_p4  ;;  %s1455_s22 = smov (%p40_p8, %s38_s22), 0 }
  0x3d   : > { %p898_p5 = scmp.lt.s32.totalorder %s1156_s10, 2  ;;  %s312_s23 = sand.u32 1, %s1144_s29  }
  0x3e   : > { %s42_s25 = ssub.s32 %s1152_s9, %s1455_s22  ;;  %p54_p3 = por %p53_p12, %p52_p4 }
  0x3f   : > { %886 = dma.hbm_to_vmem [thread:$0]  (!%p1275_p11), %s1441_s5, 512, %s296_s24, [#allocation9], %s1161_s26, %s1161_s26, %s1162_s11  }
  0x40   : > { %p43_p10 = scmp.eq.s32.totalorder %s42_s25, 0  ;;  %s798_s24 = sshll.u32 %s1152_s9, 4 }
  0x41   : > { %s315_s26 = scalar_lea.vmem [#allocation2], %s312_s23  ;;  %s320_s14 = scalar_lea.hbm %s1417_s0, %s798_s24 }
  0x42   : > { %s322_s11 = sshll.u32 %s315_s26, 4  ;;  %p1329_p2 = pnand %p898_p5, %p54_p3  ;;  %s323_s11 = int_to_ptr.vmem [resolvable:$true] %s322_s11 }
  0x43   : > { %s1324_s19 = scalar_select %p43_p10, %s1144_s29, %s45_s20  }
  0x44   : > { %s313_s3 = scalar_lea.sflag [#allocation3], %s312_s23  ;;  %p1042_p11 = pneg %p1329_p2 }
  0x45   : > { %s1053_s5 = scalar_lea.vmem %s323_s11, 16  ;;  %s1163_s25 = smov [#allocation2]  }
  0x46   : > { %p1054_p7 = scmp.ne.s32.totalorder %s323_s11, %s1053_s5  ;;  %s1058_s20 = sshll.u32 %s1163_s25, 4  ;;  %s1059_s20 = int_to_ptr.vmem [resolvable:$false] %s1058_s20 }
  0x47   : > { %s1060_s26 = scalar_lea.vmem %s1059_s20, 32  ;;  %p1061_p13 = scmp.lt.s32.totalorder %s323_s11, %s1059_s20 }
  0x48   : > { %p1056_p6 = pnand %p1054_p7, %p1042_p11  ;;  %p1062_p1 = scmp.lt.s32.totalorder %s1060_s26, %s1053_s5 }
  0x4a   : > { %p1057_p9 = pneg %p1056_p6  ;;  %p1063_p4 = por %p1062_p1, %p1061_p13 }
  0x4c   : > { %p1064_p8 = pnand %p1063_p4, %p1057_p9 }
  0x4e   : > { %1067 = shalt.err (!%p1064_p8)
}
  0x4f   : > { %890 = dma.hbm_to_vmem [thread:$0]  (!%p1329_p2), %s320_s14, 16, %s323_s11, %s313_s3  }
  0x50   : > { %p1444_p12 = scmp.ne.s32.totalorder %s1437_s17, 0 }
  0x51   : > { %s1340_s23 = sand.u32 (!%p1444_p12), 1, %s1140_s28   ;;  %p1445_p5 = scmp.ne.s32.totalorder (!%p1444_p12), %s1435_s15, 0 }
  0x52   : > { %341 = sbr.rel (%p1444_p12) target bundleno = 546 (0x222), region = 52  ;;  %s344_s24 = scalar_lea.sflag (!%p1444_p12), [#allocation3], %s1340_s23 }
  0x53   : > { %s346_s12 = scalar_lea.vmem (!%p1444_p12), [#allocation2], %s1340_s23 }
  0x57   : > { %1119 = dma.done.wait (%p1445_p5), %s344_s24, 16  }
  0x58   : > { %1121 = vsyncadd (%p1445_p5), %s344_s24, 4294967280  ;;  %p1446_p3 = scmp.ne.s32.totalorder %s1433_s13, 0 }
  0x5a   : > { %1123 = dma.done.wait (%p1446_p3), [#allocation6], 1024  }
  0x5b   : > { %1125 = vsyncadd (%p1446_p3), [#allocation6], 4294966272 }
  0x5c   : > { %1127 = dma.done.wait (%p1446_p3), [#allocation9], 512  }
  0x5d   : > { %1129 = vsyncadd (%p1446_p3), [#allocation9], 4294966784  ;;  %v1164_v0 = vmov 0.0   ;;  %vm1165_vm0 = vmmov 0   ;;  %v408_v1 = vld [vmem:[#allocation5 + $0x18] sm:$0xff]  ;;  %v407_v2 = vld [vmem:[#allocation5 + $0x10] sm:$0xff]  ;;  %v645_v23 = vlaneseq }
  0x5e   : > { %828 = vmatprep.subr.mxu0 %v1164_v0  ;;  %836 = vmatprep.mubr.msk.f32.mxu0 %vm1165_vm0, %v1164_v0  ;;  %v406_v3 = vld [vmem:[#allocation5 + $0x8] sm:$0xff]  ;;  %v405_v4 = vld [vmem:[#allocation5] sm:$0xff]  ;;  %v404_v5 = vld [vmem:[%s346_s12] sm:$0x1]  ;;  %vm410_vm1 = vcmask 261120   ;;  %p397_p10 = scmp.lt.s32.totalorder %s1148_s30, 1 }
  0x5f   : > { %839 = vmatprep.subr.mxu1 %v1164_v0  ;;  %847 = vmatprep.mubr.msk.f32.mxu1 %vm1165_vm0, %v1164_v0  ;;  %v494_v6 = vld [vmem:[#allocation7 + $0x18] sm:$0xff]  ;;  %v493_v8 = vld [vmem:[#allocation7 + $0x10] sm:$0xff]  ;;  %v492_v10 = vld [vmem:[#allocation7 + $0x8] sm:$0xff]  ;;  %v646_v24 = vshrl.u32 %v645_v23, 7  ;;  %s803_s14 = sshll.u32 %s1340_s23, 1  ;;  %s810_s24 = sshll.u32 %s1148_s30, 5 }
  0x60   : > { %829 = vmatpush3.msra.mxu0 %v408_v1  ;;  %v572_v7 = vld [vmem:[#allocation8 + $0x18] sm:$0xff]  ;;  %840 = vmatpush3.msra.mxu1 %v494_v6  ;;  %v571_v9 = vld [vmem:[#allocation8 + $0x10] sm:$0xff]  ;;  %v570_v11 = vld [vmem:[#allocation8 + $0x8] sm:$0xff]  ;;  %s398_s5 = scalar_select %p397_p10, %s1148_s30, 1 }
  0x61   : > { %830 = vmatprep.subr.mxu0 %v1164_v0  ;;  %841 = vmatprep.subr.mxu1 %v1164_v0  ;;  %v491_v12 = vld [vmem:[#allocation7] sm:$0xff]  ;;  %v409_v14 = vld [vmem:[%s1419_s2] sm:$0x1]  ;;  %v647_v27 = vsub.s32 0, %v646_v24  ;;  %s396_s12 = scalar_lea.vmem [#allocation10], %s803_s14  ;;  %s657_s15 = scalar_lea.sflag [#allocation4], %s1340_s23 }
  0x62   : > { %831 = vmatpush3.msra.mxu0 %v407_v2  ;;  %842 = vmatpush3.msra.mxu1 %v493_v8  ;;  %v569_v13 = vld [vmem:[#allocation8] sm:$0xff]  ;;  %s804_s13 = sshll.u32 %s398_s5, 1  ;;  %v495_v25 = vld [vmem:[%s1421_s4] sm:$0x1]  ;;  %s671_s1 = sshll.u32 %s396_s12, 4  ;;  %s672_s1 = int_to_ptr.vmem [resolvable:$true] %s671_s1 }
  0x63   : > { %832 = vmatprep.subr.mxu0 %v1164_v0  ;;  %843 = vmatprep.subr.mxu1 %v1164_v0  ;;  %v573_v26 = vld [vmem:[%s1423_s6] sm:$0x1]  ;;  %s403_s26 = scalar_lea.vmem %s1424_s7, %s804_s13  ;;  %s669_s13 = scalar_lea.hbm %s1425_s8, %s810_s24 }
  0x64   : > { %833 = vmatpush3.msra.mxu0 %v406_v3  ;;  %844 = vmatpush3.msra.mxu1 %v492_v10  ;;  %v644_v32 = vld [vmem:[%s403_s26] sm:$0x3]  ;;  %s1068_s17 = scalar_lea.vmem %s672_s1, 32  ;;  %s1166_s11 = smov [#allocation10]  }
  0x65   : > { %834 = vmatprep.subr.mxu0 %v1164_v0  ;;  %845 = vmatprep.subr.mxu1 %v1164_v0  ;;  %p1069_p2 = scmp.ne.s32.totalorder %s672_s1, %s1068_s17  ;;  %s1072_s18 = sshll.u32 %s1166_s11, 4  ;;  %s1073_s18 = int_to_ptr.vmem [resolvable:$false] %s1072_s18 }
  0x66   : > { %835 = vmatpush3.msra.mxu0 %v405_v4  ;;  %846 = vmatpush3.msra.mxu1 %v491_v12  ;;  %s1074_s30 = scalar_lea.vmem %s1073_s18, 64  ;;  %p1075_p6 = scmp.lt.s32.totalorder %s672_s1, %s1073_s18 }
  0x67   : > { %837 = vmatmul.mubr.msk.f32.vlgmr.msra.gmra.mxu0 %vm410_vm1, %v404_v5  ;;  %850 = vmatprep.subr.mxu0 %v1164_v0  ;;  %p1070_p11 = pnand %p1069_p2, %p1312_p0  ;;  %p1076_p9 = scmp.lt.s32.totalorder %s1074_s30, %s1068_s17 }
  0x68   : > { %858 = vmatprep.mubr.msk.f32.mxu0 %vm1165_vm0, %v1164_v0  ;;  %851 = vmatpush3.msra.mxu0 %v572_v7 }
  0x69   : > { %852 = vmatprep.subr.mxu0 %v1164_v0  ;;  %p1071_p7 = pneg %p1070_p11  ;;  %p1077_p13 = por %p1076_p9, %p1075_p6 }
  0x6a   : > { %853 = vmatpush3.msra.mxu0 %v571_v9 }
  0x6b   : > { %854 = vmatprep.subr.mxu0 %v1164_v0  ;;  %p1078_p1 = pnand %p1077_p13, %p1071_p7 }
  0x6c   : > { %855 = vmatpush3.msra.mxu0 %v570_v11 }
  0x6d   : > { %856 = vmatprep.subr.mxu0 %v1164_v0 }
  0x6e   : > { %857 = vmatpush3.msra.mxu0 %v569_v13 }
 0x127   : > { %v480_v15 = vpop.f32.mrf.mxu0 }
 0x128   : > { %v481_v16 = vadd.f32 %v480_v15, %v409_v14 }
 0x129   : > { %v838_v17 = vpop.f32.mrf.mxu0 }
 0x12a   : > { %v806_v18 = vmul.f32 -1.442695, %v481_v16 }
 0x12c   : > { %958 = vpow2.f32 %v806_v18 }
 0x139   : > { %v959_v19 = vpop.eup %958 }
 0x13a   : > { %v487_v20 = vadd.f32 1.0, %v959_v19 }
 0x13c   : > { %960 = vrcp.f32 %v487_v20 }
 0x149   : > { %v961_v21 = vpop.eup %960 }
 0x14a   : > { %v490_v22 = vmul.f32 %v961_v21, %v481_v16 }
 0x14c   : > { %848 = vmatmul.mubr.msk.f32.vlgmr.msra.gmra.mxu1 %vm410_vm1, %v490_v22  ;;  %859 = vmatmul.mubr.msk.f32.vlgmr.msra.gmra.mxu0 %vm410_vm1, %v490_v22 }
 0x20c   : > { %v565_v28 = vpop.f32.mrf.mxu1  ;;  %v640_v29 = vpop.f32.mrf.mxu0 }
 0x20d   : > { %v566_v30 = vadd.f32 %v565_v28, %v495_v25  ;;  %v641_v31 = vadd.f32 %v640_v29, %v573_v26 }
 0x20e   : > { %v849_v33 = vpop.f32.mrf.mxu1  ;;  %v860_v34 = vpop.f32.mrf.mxu0 }
 0x20f   : > { %v648_v35 = vrot.slane %v566_v30, %v647_v27  ;;  %v653_v37 = vrot.slane %v641_v31, %v647_v27 }
 0x211   : > { %v649_v36 = vmul.f32 %v648_v35, %v644_v32 }
 0x213   : > { %v654_v38 = vadd.f32 %v653_v37, %v649_v36 }
 0x215   : > { %655 = vst [vmem:[%s396_s12] sm:$0x3] %v654_v38 }
 0x216   : > { %1081 = shalt.err (!%p1078_p1)
}
 0x217   : > { %s1082_s14 = scalar_lea.hbm %s669_s13, 32  ;;  %s1086_s20 = scalar_lea.hbm %s1425_s8, 64 }
 0x218   : > { %p1083_p4 = scmp.ne.s32.totalorder %s669_s13, %s1082_s14  ;;  %p1087_p5 = scmp.lt.s32.totalorder %s669_s13, %s1425_s8 }
 0x219   : > { %p1088_p3 = scmp.lt.s32.totalorder %s1086_s20, %s1082_s14 }
 0x21a   : > { %p1084_p8 = pnand %p1083_p4, %p1312_p0 }
 0x21b   : > { %p1089_p10 = por %p1088_p3, %p1087_p5 }
 0x21c   : > { %p1085_p12 = pneg %p1084_p8 }
 0x21e   : > { %p1090_p2 = pnand %p1089_p10, %p1085_p12 }
 0x220   : > { %1093 = shalt.err (!%p1090_p2)
}
 0x221   : > { %875 = dma.vmem_to_hbm [thread:$0]  (%p1312_p0), %s672_s1, 32, %s669_s13, %s657_s15  }
 0x222 PF: > { %s683_s12 = sand.u32 1, %s1136_s27   ;;  %p1447_p11 = scmp.ne.s32.totalorder %s1436_s16, 0 }
 0x223   : > { %p1448_p7 = scmp.ge.s32.totalorder %s1156_s10, 2  ;;  %s684_s3 = scalar_lea.sflag [#allocation4], %s683_s12 }
 0x225   : > { %p892_p6 = pnand %p1448_p7, %p1447_p11 }
 0x227   : > { %p893_p9 = pneg %p892_p6 }
 0x229   : > { %1131 = dma.done.wait (%p893_p9), %s684_s3, 32  }
 0x22a   : > { %1133 = vsyncadd (%p893_p9), %s684_s3, 4294967264  ;;  %s26_s10 = sadd.s32 1, %s1156_s10   ;;  %s1449_s27 = smov %s1140_s28 }
 0x22b   : > { %p23_p13 = scmp.ge.s32.totalorder %s26_s10, 4   ;;  %s1450_s28 = smov %s1144_s29 }
 0x22c   : > { %s1451_s29 = smov %s1324_s19  ;;  %s1452_s30 = smov %s1152_s9 }
 0x22d   : > { %s1453_s9 = smov %s1455_s22  ;;  %25 = sbr.rel (!%p23_p13) target bundleno = 12 (0xc), region = 112 }
 0x232   :  { %689 = vsyncpa [#allocation3], 1 }
 0x233   :  { %691 = vsyncpa [#allocation3 + $0x1], 1 }
 0x234   :  { %692 = vsyncpa [#allocation6], 1 }
 0x235   :  { %693 = vsyncpa [#allocation9], 1 }
 0x236   :  { %694 = vsyncpa [#allocation4], 1 }
 0x237   :  { %696 = vsyncpa [#allocation4 + $0x1], 1 }

</bundles_post_ra>
